<compile_context>
chip_gen: v6e
topology: v6e:2x2x1
jax: 0.10.0
libtpu: 0.0.40
codegen_flags: <defaults>
</compile_context>

<pallas_src>
import jax
import jax.numpy as jnp
from jax.experimental import pallas as pl
from jax.experimental.pallas import tpu as pltpu


def _lora_kernel(w_ref, b_ref, a_ref, o_ref):
    # delta tile = B_tile (to, r) @ A_tile (r, ti) -> (to, ti), accumulated in
    # f32 on the MXU; add in f32 then cast back to the weight dtype.
    delta = jnp.dot(b_ref[...], a_ref[...], preferred_element_type=jnp.float32)
    o_ref[...] = (w_ref[...].astype(jnp.float32) + delta).astype(o_ref.dtype)


def _default_tiles(out_features, in_features, itemsize):
    # Sublane packing: f32 -> 8 rows/vreg, bf16 -> 16, int8/fp8 -> 32.
    sublane = max(8, 32 // max(itemsize, 1))
    max_tile_out = 512          # multiple of 8/16/32 -> always sublane-aligned
    max_tile_in = 2048          # multiple of 128 -> lane-dense output stores
    # If the dim fits in one block, use the full dim (always legal as a block
    # shape); otherwise use an aligned tile and let Pallas mask the remainder.
    tile_out = out_features if out_features <= max_tile_out else max_tile_out
    tile_in = in_features if in_features <= max_tile_in else max_tile_in
    del sublane  # alignment is guaranteed by the constants above
    return tile_out, tile_in


def _vmem_limit_bytes(tile_out, tile_in, rank, itemsize):
    # Double-buffered W-in tile + out tile dominate; B tile / A block are tiny.
    tile_bytes = tile_out * tile_in * itemsize
    lora_bytes = (tile_out * rank + rank * tile_in) * itemsize
    need = 2 * 2 * tile_bytes + 2 * lora_bytes
    # 1.5x headroom for compiler scratch; floor at 32 MiB (v5e default is only
    # 16 MiB), cap at 56 MiB to stay inside v7x's 64 MiB physical VMEM.
    return int(min(max(need * 3 // 2 + (2 << 20), 32 << 20), 56 << 20))


def lora_forward(weight, lora_B, lora_A, *, tile_out=None, tile_in=None):
    """weight: (O, I), lora_B: (O, r), lora_A: (r, I) -> weight + B @ A."""
    out_features, in_features = weight.shape
    rank = lora_A.shape[0]
    assert lora_B.shape == (out_features, rank)
    assert lora_A.shape == (rank, in_features)

    itemsize = jnp.dtype(weight.dtype).itemsize
    d_to, d_ti = _default_tiles(out_features, in_features, itemsize)
    tile_out = d_to if tile_out is None else min(tile_out, out_features)
    tile_in = d_ti if tile_in is None else min(tile_in, in_features)

    grid = (pl.cdiv(out_features, tile_out), pl.cdiv(in_features, tile_in))

    cost = pl.CostEstimate(
        flops=2 * out_features * rank * in_features,
        transcendentals=0,
        bytes_accessed=(2 * out_features * in_features
                        + out_features * rank
                        + rank * in_features) * itemsize,
    )

    return pl.pallas_call(
        _lora_kernel,
        out_shape=jax.ShapeDtypeStruct((out_features, in_features), weight.dtype),
        grid_spec=pltpu.PrefetchScalarGridSpec(
            num_scalar_prefetch=0,
            grid=grid,
            in_specs=[
                pl.BlockSpec((tile_out, tile_in), lambda i, j: (i, j)),  # weight
                pl.BlockSpec((tile_out, rank), lambda i, j: (i, 0)),     # lora_B
                pl.BlockSpec((rank, tile_in), lambda i, j: (0, j)),      # lora_A
            ],
            out_specs=pl.BlockSpec((tile_out, tile_in), lambda i, j: (i, j)),
        ),
        compiler_params=pltpu.CompilerParams(
            dimension_semantics=("parallel", "parallel"),
            vmem_limit_bytes=_vmem_limit_bytes(tile_out, tile_in, rank, itemsize),
        ),
        cost_estimate=cost,
    )(weight, lora_B, lora_A)


if __name__ == "__main__":
    key = jax.random.PRNGKey(0)
    k_w, k_a, k_b, k_w2, k_a2, k_b2 = jax.random.split(key, 6)

    # Small Linear weight implied by the module: (out_features, in_features).
    O, I, rank = 64, 128, 8
    weight = jax.random.normal(k_w, (O, I), dtype=jnp.float32)

    # Matches LoRAParametrization.initialize_lora: A ~ N(0, 1), B = zeros,
    # so at init the output must equal the weight exactly.
    lora_A = jax.random.normal(k_a, (rank, I), dtype=jnp.float32)
    lora_B = jnp.zeros((O, rank), dtype=jnp.float32)

    out = lora_forward(weight, lora_B, lora_A)
    jax.block_until_ready(out)
    ref = weight + lora_B @ lora_A
    assert jnp.allclose(out, ref, atol=1e-5), "mismatch at init (B=0)"

    # Non-zero B (as after training) so the in-kernel matmul path is exercised.
    lora_B_t = 0.01 * jax.random.normal(k_b, (O, rank), dtype=jnp.float32)
    out2 = lora_forward(weight, lora_B_t, lora_A)
    jax.block_until_ready(out2)
    ref2 = weight + lora_B_t @ lora_A
    assert jnp.allclose(out2, ref2, atol=1e-4), "mismatch with non-zero B"

    # Ragged shape with forced small tiles to exercise the 2-D grid and the
    # masked remainder blocks (O % tile_out != 0, I % tile_in != 0).
    O2, I2 = 272, 640
    weight2 = jax.random.normal(k_w2, (O2, I2), dtype=jnp.float32)
    lora_A2 = jax.random.normal(k_a2, (rank, I2), dtype=jnp.float32)
    lora_B2 = 0.02 * jax.random.normal(k_b2, (O2, rank), dtype=jnp.float32)
    out3 = lora_forward(weight2, lora_B2, lora_A2, tile_out=128, tile_in=256)
    jax.block_until_ready(out3)
    ref3 = weight2 + lora_B2 @ lora_A2
    assert jnp.allclose(out3, ref3, atol=1e-4), "mismatch on ragged 2-D tiling"

    print("KERNEL_OK")
</pallas_src>

<mosaic_0001>
module attributes {stable_mosaic.version = 11 : i64} {
  func.func @_lora_kernel(%arg0: i32, %arg1: i32, %arg2: memref<64x128xf32, #tpu.memory_space<vmem>>, %arg3: memref<64x8xf32, #tpu.memory_space<vmem>>, %arg4: memref<8x128xf32, #tpu.memory_space<vmem>>, %arg5: memref<64x128xf32, #tpu.memory_space<vmem>>) attributes {dimension_semantics = [#tpu.dimension_semantics<parallel>, #tpu.dimension_semantics<parallel>], iteration_bounds = array<i64: 1, 1>, scalar_prefetch = 0 : i64, scratch_operands = 0 : i64, tpu.core_type = #tpu.core_type<tc>, window_params = [{transform_indices = @transform_0, window_bounds = array<i64: 64, 128>}, {transform_indices = @transform_1, window_bounds = array<i64: 64, 8>}, {transform_indices = @transform_2, window_bounds = array<i64: 8, 128>}, {transform_indices = @transform_3, window_bounds = array<i64: 64, 128>}]} {
    %c0 = arith.constant 0 : index
    %c0_0 = arith.constant 0 : index
    %0 = vector.load %arg3[%c0, %c0_0] : memref<64x8xf32, #tpu.memory_space<vmem>>, vector<64x8xf32>
    %c0_1 = arith.constant 0 : index
    %c0_2 = arith.constant 0 : index
    %1 = vector.load %arg4[%c0_1, %c0_2] : memref<8x128xf32, #tpu.memory_space<vmem>>, vector<8x128xf32>
    %cst = arith.constant dense<0.000000e+00> : vector<64x128xf32>
    %2 = tpu.matmul %0, %1, %cst {dimension_numbers = #tpu.dot_dimension_numbers<[1], [0], [0], [1], [0, 0, 1, 1], [], []>} : vector<64x8xf32>, vector<8x128xf32>, vector<64x128xf32> -> vector<64x128xf32>
    %c0_3 = arith.constant 0 : index
    %c0_4 = arith.constant 0 : index
    %3 = vector.load %arg2[%c0_3, %c0_4] : memref<64x128xf32, #tpu.memory_space<vmem>>, vector<64x128xf32>
    %4 = arith.addf %3, %2 : vector<64x128xf32>
    %c0_5 = arith.constant 0 : index
    %c0_6 = arith.constant 0 : index
    %5 = vector.load %arg5[%c0_5, %c0_6] : memref<64x128xf32, #tpu.memory_space<vmem>>, vector<64x128xf32>
    tpu.vector_store %arg5[%c0_5, %c0_6], %4 {strides = array<i32>} : memref<64x128xf32, #tpu.memory_space<vmem>>, vector<64x128xf32>,
    return
  }
  func.func @transform_0(%arg0: i32, %arg1: i32) -> (i32, i32) {
    %c0_i32 = arith.constant 0 : i32
    return %arg0, %arg1 : i32, i32
  }
  func.func @transform_1(%arg0: i32, %arg1: i32) -> (i32, i32) {
    %c0_i32 = arith.constant 0 : i32
    %c0_i32_0 = arith.constant 0 : i32
    return %arg0, %c0_i32 : i32, i32
  }
  func.func @transform_2(%arg0: i32, %arg1: i32) -> (i32, i32) {
    %c0_i32 = arith.constant 0 : i32
    %c0_i32_0 = arith.constant 0 : i32
    return %c0_i32, %arg1 : i32, i32
  }
  func.func @transform_3(%arg0: i32, %arg1: i32) -> (i32, i32) {
    %c0_i32 = arith.constant 0 : i32
    return %arg0, %arg1 : i32, i32
  }
}

</mosaic_0001>

<bundles_post_ra>
// kernel: tpu_custom_call.1
= control target key start
LH: loop header
LB: loop body
LE: loop exit
PB: predicated region body
PF: predicated region fallthrough
CT: control target
= control target key end

     0   :  { %vm24_vm0 = vcmask 64512   ;;  %s337_s0 = inlined_call_operand.vmem [shape: f32[64,128], index: 0, kind: input, shape index: {}]   ;;  %s338_s1 = inlined_call_operand.vmem [shape: f32[64,8], index: 1, kind: input, shape index: {}]   ;;  %s339_s2 = inlined_call_operand.vmem [shape: f32[8,128], index: 2, kind: input, shape index: {}]   ;;  %s340_s3 = inlined_call_operand.hbm [shape: f32[64,128], index: 3, kind: output, shape index: {}]  }
   0x1   :  { %v23_v0 = vld [vmem:[%s339_s2] sm:$0xff]  ;;  %v16_v3 = vld [vmem:[%s338_s1 + $0x8] sm:$0xff]  ;;  %v17_v5 = vld [vmem:[%s338_s1 + $0x10] sm:$0xff] }
   0x2   :  { %v15_v1 = vld [vmem:[%s338_s1] sm:$0xff]  ;;  %211 = vmatprep.subr.mxu0 %v23_v0  ;;  %225 = vmatprep.subr.mxu1 %v23_v0  ;;  %v20_v4 = vld [vmem:[%s338_s1 + $0x28] sm:$0xff]  ;;  %v21_v6 = vld [vmem:[%s338_s1 + $0x30] sm:$0xff] }
   0x3   :  { %v19_v2 = vld [vmem:[%s338_s1 + $0x20] sm:$0xff]  ;;  %212 = vmatpush3.msra.mxu0 %v23_v0  ;;  %226 = vmatpush3.msra.mxu1 %v23_v0 }
   0x4   :  { %213 = vmatprep.mubr.msk.f32.mxu0 %vm24_vm0, %v15_v1  ;;  %219 = vmatprep.mubr.msk.f32.mxu1 %vm24_vm0, %v19_v2 }
   0x5   :  { %8 = vsyncpa [#allocation3], 0  ;;  %214 = vmatmul.mubr.msk.f32.vlgmr.msra.gmra.mxu0 %vm24_vm0, %v16_v3  ;;  %220 = vmatmul.mubr.msk.f32.vlgmr.msra.gmra.mxu1 %vm24_vm0, %v20_v4  ;;  %v18_v7 = vld [vmem:[%s338_s1 + $0x18] sm:$0xff]  ;;  %v155_v9 = vld [vmem:[%s337_s0 + $0x8] sm:$0xff]  ;;  %s252_s13 = smov [#allocation2]  }
   0x6   :  { %216 = vmatprep.mubr.msk.f32.mxu0 %vm24_vm0, %v17_v5  ;;  %222 = vmatprep.mubr.msk.f32.mxu1 %vm24_vm0, %v21_v6  ;;  %v22_v8 = vld [vmem:[%s338_s1 + $0x38] sm:$0xff]  ;;  %v159_v10 = vld [vmem:[%s337_s0 + $0x28] sm:$0xff]  ;;  %v154_v13 = vld [vmem:[%s337_s0] sm:$0xff]  ;;  %s183_s14 = sshll.u32 %s252_s13, 4  ;;  %s184_s14 = int_to_ptr.vmem [resolvable:$true] %s183_s14 }
   0x7   :  { %v158_v14 = vld [vmem:[%s337_s0 + $0x20] sm:$0xff]  ;;  %v157_v19 = vld [vmem:[%s337_s0 + $0x18] sm:$0xff]  ;;  %v156_v25 = vld [vmem:[%s337_s0 + $0x10] sm:$0xff]  ;;  %s230_s19 = scalar_lea.vmem %s184_s14, 1024  ;;  %p235_p1 = scmp.lt.s32.totalorder %s184_s14, %s184_s14 }
   0x8   :  { %v161_v20 = vld [vmem:[%s337_s0 + $0x38] sm:$0xff]  ;;  %v160_v26 = vld [vmem:[%s337_s0 + $0x30] sm:$0xff]  ;;  %p231_p0 = scmp.ne.s32.totalorder %s184_s14, %s230_s19  ;;  %p236_p2 = scmp.lt.s32.totalorder %s230_s19, %s230_s19 }
   0x9   :  { %217 = vmatmul.mubr.msk.f32.gmra.mxu0 %vm24_vm0, %v18_v7  ;;  %223 = vmatmul.mubr.msk.f32.gmra.mxu1 %vm24_vm0, %v22_v8 }
   0xa   :  { %p237_p3 = por %p236_p2, %p235_p1 }
   0xc   :  { %p238_p4 = pnand %p237_p3, %p231_p0 }
  0xc5   :  { %v215_v11 = vpop.f32.mrf.mxu0  ;;  %v221_v12 = vpop.f32.mrf.mxu1 }
  0xc6   :  { %v163_v15 = vadd.f32 %v215_v11, %v155_v9  ;;  %v167_v16 = vadd.f32 %v221_v12, %v159_v10 }
  0xc7   :  { %v115_v17 = vpop.f32.mrf.mxu0  ;;  %v135_v18 = vpop.f32.mrf.mxu1 }
  0xc8   :  { %171 = vst [vmem:[#allocation2 + $0x8] sm:$0xff] %v163_v15  ;;  %175 = vst [vmem:[#allocation2 + $0x28] sm:$0xff] %v167_v16  ;;  %v162_v21 = vadd.f32 %v154_v13, %v115_v17  ;;  %v166_v22 = vadd.f32 %v158_v14, %v135_v18 }
  0xc9   :  { %v218_v23 = vpop.f32.mrf.mxu0  ;;  %v224_v24 = vpop.f32.mrf.mxu1 }
  0xca   :  { %170 = vst [vmem:[#allocation2] sm:$0xff] %v162_v21  ;;  %174 = vst [vmem:[#allocation2 + $0x20] sm:$0xff] %v166_v22  ;;  %v165_v27 = vadd.f32 %v218_v23, %v157_v19  ;;  %v169_v28 = vadd.f32 %v224_v24, %v161_v20 }
  0xcb   :  { %v125_v29 = vpop.f32.mrf.mxu0  ;;  %v145_v30 = vpop.f32.mrf.mxu1 }
  0xcc   :  { %173 = vst [vmem:[#allocation2 + $0x18] sm:$0xff] %v165_v27  ;;  %177 = vst [vmem:[#allocation2 + $0x38] sm:$0xff] %v169_v28  ;;  %v164_v31 = vadd.f32 %v156_v25, %v125_v29  ;;  %v168_v32 = vadd.f32 %v160_v26, %v145_v30 }
  0xce   :  { %172 = vst [vmem:[#allocation2 + $0x10] sm:$0xff] %v164_v31  ;;  %176 = vst [vmem:[#allocation2 + $0x30] sm:$0xff] %v168_v32 }
  0xcf   :  { %241 = shalt.err (!%p238_p4)
}
  0xd0   :  { %s253_s0 = smov 128   ;;  %s254_s20 = smov 8  }
  0xd1   :  { %189 = dma.vmem_to_hbm [thread:$0]  %s184_s14, 1024, %s340_s3, [#allocation3], %s253_s0, %s253_s0, %s254_s20  }
  0xd2   :  { %250 = dma.done.wait [#allocation3], 1024  }
  0xd3   :  { %251 = vsyncadd [#allocation3], 4294966272 }
  0xd4   :  { %193 = vsyncpa [#allocation3], 1 }

</bundles_post_ra>
